<compile_context>
chip_gen: v7x
topology: tpu7x:2x2x1
jax: 0.10.0
libtpu: 0.0.40
codegen_flags: <defaults>
</compile_context>

<pallas_src>
import functools

import jax
import jax.numpy as jnp
import numpy as np
from jax.experimental import pallas as pl
from jax.experimental.pallas import tpu as pltpu


def build_mask(in_features: int, out_features: int, diagonal_zeros: bool) -> np.ndarray:
    """Numpy re-implementation of MaskedLinear.build_mask (identical semantics)."""
    n_in, n_out = in_features, out_features
    assert n_in % n_out == 0 or n_out % n_in == 0
    mask = np.ones((n_in, n_out), dtype=np.float32)
    if n_out >= n_in:
        k = n_out // n_in
        for i in range(n_in):
            mask[i + 1:, i * k:(i + 1) * k] = 0
            if diagonal_zeros:
                mask[i:i + 1, i * k:(i + 1) * k] = 0
    else:
        k = n_in // n_out
        for i in range(n_out):
            mask[(i + 1) * k:, i:i + 1] = 0
            if diagonal_zeros:
                mask[i * k:(i + 1) * k, i:i + 1] = 0
    return mask


def _round_up(x: int, m: int) -> int:
    return ((x + m - 1) // m) * m


def _pick_tile(dim: int, max_tile: int, align: int) -> int:
    """Largest tile <= max_tile (multiple of align) minimizing padding of `dim`."""
    dim_a = _round_up(max(dim, 1), align)
    if dim_a <= max_tile:
        return dim_a
    nblocks = -(-dim_a // max_tile)          # ceil
    return _round_up(-(-dim_a // nblocks), align)


def _pad_to(a, target_shape):
    pads = [(0, t - s) for s, t in zip(a.shape, target_shape)]
    if any(p[1] for p in pads):
        a = jnp.pad(a, pads)
    return a


# ---------------------------------------------------------------------------
# Kernels: (M, N, K) grid, K innermost.  f32 accumulator lives in VMEM scratch
# and is resident across the K axis (output BlockSpec returns the same (i, j)
# block for every k).  The scalar-prefetched k_limit[j] gates the MXU work so
# fully-masked (K, N) blocks are skipped (their DMA is elided by the clamped
# index_map).  Bias is added exactly once, in the finalize branch.
# ---------------------------------------------------------------------------
def _mm_bias_kernel(klim_ref, x_ref, w_ref, b_ref, o_ref, acc_ref):
    j = pl.program_id(1)
    k = pl.program_id(2)

    @pl.when(k == 0)
    def _init():
        acc_ref[...] = jnp.zeros_like(acc_ref)

    @pl.when(k < klim_ref[j])
    def _accum():
        acc_ref[...] += jnp.dot(
            x_ref[...], w_ref[...], preferred_element_type=jnp.float32
        )

    @pl.when(k == pl.num_programs(2) - 1)
    def _finalize():
        o_ref[...] = (acc_ref[...] + b_ref[...]).astype(o_ref.dtype)


def _mm_kernel(klim_ref, x_ref, w_ref, o_ref, acc_ref):
    j = pl.program_id(1)
    k = pl.program_id(2)

    @pl.when(k == 0)
    def _init():
        acc_ref[...] = jnp.zeros_like(acc_ref)

    @pl.when(k < klim_ref[j])
    def _accum():
        acc_ref[...] += jnp.dot(
            x_ref[...], w_ref[...], preferred_element_type=jnp.float32
        )

    @pl.when(k == pl.num_programs(2) - 1)
    def _finalize():
        o_ref[...] = acc_ref[...].astype(o_ref.dtype)


# ---------------------------------------------------------------------------
# One-time (per layer) precompute: fused/cast/padded weight, padded bias,
# per-N-block K limits, tile sizes.  This is the part the perf review wanted
# hoisted out of the per-step hot path.
# ---------------------------------------------------------------------------
def prepare_masked_linear(weight, mask, bias=None, *,
                          compute_dtype=jnp.bfloat16, tn=512, tk=1024):
    weight = jnp.asarray(weight)
    K, N = weight.shape
    mask_np = np.asarray(mask, dtype=np.float32)
    assert mask_np.shape == (K, N)

    tn_ = _pick_tile(N, tn, 128)
    Np = _round_up(_round_up(N, 128), tn_)
    # v7x megacore: ensure >= 2 blocks on the (parallel) N axis whenever it can,
    # so both TensorCores get work even when the batch fits in a single M block.
    if Np // tn_ < 2 and Np >= 256:
        tn_ = _pick_tile(N, _round_up(Np // 2, 128), 128)
        Np = _round_up(_round_up(N, 128), tn_)
    tk_ = _pick_tile(K, tk, 128)
    Kp = _round_up(_round_up(K, 128), tk_)

    # Per-N-block reduction extent: last K block holding any unmasked weight.
    n_nblocks = Np // tn_
    mask_pad = np.zeros((Kp, Np), dtype=np.float32)
    mask_pad[:K, :N] = mask_np
    k_limit = np.zeros((n_nblocks,), dtype=np.int32)
    for j in range(n_nblocks):
        nz = np.nonzero(mask_pad[:, j * tn_:(j + 1) * tn_].any(axis=1))[0]
        if nz.size:
            k_limit[j] = int(nz[-1]) // tk_ + 1

    # Fuse the static mask into the weight once: no mask stream over HBM and no
    # per-tile VPU re-multiply inside the kernel.  Cast to the compute dtype
    # (bf16 by default) so the dominant weight DMA stream is halved.
    w_fused = (jnp.asarray(mask_np, dtype=weight.dtype) * weight).astype(compute_dtype)
    w_p = _pad_to(w_fused, (Kp, Np))

    b_p = None
    if bias is not None:
        b_p = _pad_to(jnp.asarray(bias, jnp.float32), (Np,)).reshape(1, Np)

    return dict(w=w_p, b=b_p, k_limit=jnp.asarray(k_limit),
                tn=int(tn_), tk=int(tk_), n_out=int(N), n_in=int(K))


@functools.partial(jax.jit, static_argnames=("tn", "tk", "n_out", "tm", "use_bias"))
def _masked_linear_call(x, w_p, b_p, k_limit, *, tn, tk, n_out, tm, use_bias):
    B, K = x.shape
    Kp, Np = w_p.shape
    out_dtype = x.dtype

    tm_ = _pick_tile(B, tm, 8)
    Mp = _round_up(_round_up(B, 8), tm_)
    x_p = _pad_to(x.astype(w_p.dtype), (Mp, Kp))

    grid = (Mp // tm_, Np // tn, Kp // tk)

    # Clamp k to the last useful K block of this N block: skipped steps keep
    # referencing an already-resident block, so no DMA is issued for them.
    def _x_map(i, j, k, klim):
        kk = jnp.minimum(k, jnp.maximum(klim[j] - 1, 0))
        return (i, kk)

    def _w_map(i, j, k, klim):
        kk = jnp.minimum(k, jnp.maximum(klim[j] - 1, 0))
        return (kk, j)

    x_spec = pl.BlockSpec((tm_, tk), _x_map)
    w_spec = pl.BlockSpec((tk, tn), _w_map)
    o_spec = pl.BlockSpec((tm_, tn), lambda i, j, k, klim: (i, j))

    in_specs = [x_spec, w_spec]
    operands = [x_p, w_p]
    if use_bias:
        in_specs.append(pl.BlockSpec((1, tn), lambda i, j, k, klim: (0, j)))
        operands.append(b_p)
        kernel = _mm_bias_kernel
    else:
        kernel = _mm_kernel

    c_bytes = jnp.dtype(w_p.dtype).itemsize
    o_bytes = jnp.dtype(out_dtype).itemsize

    # Scoped VMEM limit derived from the real double-buffered footprint; with the
    # default tiles this stays ~a few MiB, far under v7x's 64 MiB physical VMEM.
    tile_bytes = (2 * (tm_ * tk + tk * tn) * c_bytes   # double-buffered x/w tiles
                  + 2 * tm_ * tn * o_bytes             # double-buffered out tile
                  + tm_ * tn * 4                       # f32 accumulator scratch
                  + (2 * tn * 4 if use_bias else 0))
    vmem_limit = min(max(3 * tile_bytes, 32 * 1024 * 1024), 96 * 1024 * 1024)

    cost = pl.CostEstimate(
        flops=2 * Mp * Np * Kp,
        transcendentals=0,
        bytes_accessed=(Mp * Kp + Kp * Np) * c_bytes + Mp * Np * o_bytes,
    )

    out_p = pl.pallas_call(
        kernel,
        out_shape=jax.ShapeDtypeStruct((Mp, Np), out_dtype),
        grid_spec=pltpu.PrefetchScalarGridSpec(
            num_scalar_prefetch=1,
            grid=grid,
            in_specs=in_specs,
            out_specs=o_spec,
            scratch_shapes=[pltpu.VMEM((tm_, tn), jnp.float32)],
        ),
        compiler_params=pltpu.CompilerParams(
            dimension_semantics=("parallel", "parallel", "arbitrary"),
            vmem_limit_bytes=vmem_limit,
        ),
        cost_estimate=cost,
    )(k_limit, *operands)

    return out_p[:B, :n_out]


def masked_linear_apply(x, params, *, tm=512):
    """Hot-path apply: y = x @ (mask * W) [+ bias] using precomputed params."""
    return _masked_linear_call(
        x, params["w"], params["b"], params["k_limit"],
        tn=params["tn"], tk=params["tk"], n_out=params["n_out"],
        tm=tm, use_bias=params["b"] is not None)


def masked_linear(x, weight, mask, bias=None, *, compute_dtype=jnp.bfloat16,
                  tm=512, tn=512, tk=1024):
    """One-shot convenience wrapper (prefer prepare + apply inside training loops)."""
    params = prepare_masked_linear(weight, mask, bias,
                                   compute_dtype=compute_dtype, tn=tn, tk=tk)
    return masked_linear_apply(x, params, tm=tm)


if __name__ == "__main__":
    key = jax.random.PRNGKey(0)

    # --- Test 1: small layer, default bf16 weight/x stream, bias ------------
    batch, in_features, out_features = 8, 32, 64
    kx, kw = jax.random.split(key)
    x = jax.random.normal(kx, (batch, in_features), dtype=jnp.float32)
    std = np.sqrt(2.0 / out_features)           # kaiming_normal_-like init
    weight = jax.random.normal(kw, (in_features, out_features), dtype=jnp.float32) * std
    bias = jnp.zeros((out_features,), dtype=jnp.float32)
    mask = build_mask(in_features, out_features, diagonal_zeros=True)

    params = prepare_masked_linear(weight, mask, bias)       # precomputed once
    y = jax.block_until_ready(masked_linear_apply(x, params))

    y_ref = np.asarray(x, np.float64) @ (mask.astype(np.float64) *
                                         np.asarray(weight, np.float64))
    np.testing.assert_allclose(np.asarray(y), y_ref, rtol=3e-2, atol=3e-2)

    # --- Test 2: larger square layer, f32 exact-parity path, multi-block
    #     grid exercising the block-triangular k_limit skipping --------------
    B2, K2, N2 = 64, 512, 512
    k1, k2 = jax.random.split(jax.random.PRNGKey(1))
    x2 = jax.random.normal(k1, (B2, K2), dtype=jnp.float32)
    w2 = jax.random.normal(k2, (K2, N2), dtype=jnp.float32) * np.sqrt(2.0 / N2)
    b2 = jnp.zeros((N2,), dtype=jnp.float32)
    m2 = build_mask(K2, N2, diagonal_zeros=False)

    params2 = prepare_masked_linear(w2, m2, b2, compute_dtype=jnp.float32,
                                    tn=128, tk=128)
    y2 = jax.block_until_ready(masked_linear_apply(x2, params2, tm=64))
    y2_ref = np.asarray(x2, np.float64) @ (m2.astype(np.float64) *
                                           np.asarray(w2, np.float64))
    np.testing.assert_allclose(np.asarray(y2), y2_ref, rtol=2e-4, atol=2e-4)

    # --- Test 3: n_in > n_out, no bias, bf16 default -------------------------
    B3, K3, N3 = 16, 64, 16
    k3, k4 = jax.random.split(jax.random.PRNGKey(2))
    x3 = jax.random.normal(k3, (B3, K3), dtype=jnp.float32)
    w3 = jax.random.normal(k4, (K3, N3), dtype=jnp.float32) * np.sqrt(2.0 / N3)
    m3 = build_mask(K3, N3, diagonal_zeros=False)

    y3 = jax.block_until_ready(masked_linear(x3, w3, m3, bias=None))
    y3_ref = np.asarray(x3, np.float64) @ (m3.astype(np.float64) *
                                           np.asarray(w3, np.float64))
    np.testing.assert_allclose(np.asarray(y3), y3_ref, rtol=5e-2, atol=5e-2)

    print("KERNEL_OK")
</pallas_src>

<mosaic_0001>
module attributes {stable_mosaic.version = 11 : i64} {
  func.func @_mm_bias_kernel(%arg0: i32, %arg1: i32, %arg2: i32, %arg3: memref<1xi32, #tpu.memory_space<smem>>, %arg4: memref<8x128xbf16, #tpu.memory_space<vmem>>, %arg5: memref<128x128xbf16, #tpu.memory_space<vmem>>, %arg6: memref<1x128xf32, #tpu.memory_space<vmem>>, %arg7: memref<8x128xf32, #tpu.memory_space<vmem>>, %arg8: memref<8x128xf32, #tpu.memory_space<vmem>>) attributes {dimension_semantics = [#tpu.dimension_semantics<parallel>, #tpu.dimension_semantics<parallel>, #tpu.dimension_semantics<arbitrary>], iteration_bounds = array<i64: 1, 1, 1>, scalar_prefetch = 1 : i64, scratch_operands = 1 : i64, tpu.core_type = #tpu.core_type<tc>, window_params = [{transform_indices = @transform_0, window_bounds = array<i64: 8, 128>}, {transform_indices = @transform_1, window_bounds = array<i64: 128, 128>}, {transform_indices = @transform_2, window_bounds = array<i64: 1, 128>}, {transform_indices = @transform_3, window_bounds = array<i64: 8, 128>}]} {
    %c0_i32 = arith.constant 0 : i32
    %0 = arith.cmpi eq, %arg2, %c0_i32 : i32
    %1 = arith.extui %0 : i1 to i32
    %c0_i32_0 = arith.constant 0 : i32
    %2 = arith.cmpi ne, %1, %c0_i32_0 : i32
    scf.if %2 {
      %cst = arith.constant 0.000000e+00 : f32
      %11 = vector.broadcast %cst : f32 to vector<8x128xf32>
      %c0 = arith.constant 0 : index
      %c0_4 = arith.constant 0 : index
      %12 = vector.load %arg8[%c0, %c0_4] : memref<8x128xf32, #tpu.memory_space<vmem>>, vector<8x128xf32>
      tpu.vector_store %arg8[%c0, %c0_4], %11 {strides = array<i32>} : memref<8x128xf32, #tpu.memory_space<vmem>>, vector<8x128xf32>,
    } else {
    }
    %3 = arith.index_cast %arg1 : i32 to index
    %4 = memref.load %arg3[%3] : memref<1xi32, #tpu.memory_space<smem>>
    %5 = arith.cmpi slt, %arg2, %4 : i32
    %6 = arith.extui %5 : i1 to i32
    %c0_i32_1 = arith.constant 0 : i32
    %7 = arith.cmpi ne, %6, %c0_i32_1 : i32
    scf.if %7 {
      %c0 = arith.constant 0 : index
      %c0_4 = arith.constant 0 : index
      %11 = vector.load %arg8[%c0, %c0_4] : memref<8x128xf32, #tpu.memory_space<vmem>>, vector<8x128xf32>
      %c0_5 = arith.constant 0 : index
      %c0_6 = arith.constant 0 : index
      %12 = vector.load %arg4[%c0_5, %c0_6] : memref<8x128xbf16, #tpu.memory_space<vmem>>, vector<8x128xbf16>
      %c0_7 = arith.constant 0 : index
      %c0_8 = arith.constant 0 : index
      %13 = vector.load %arg5[%c0_7, %c0_8] : memref<128x128xbf16, #tpu.memory_space<vmem>>, vector<128x128xbf16>
      %cst = arith.constant dense<0.000000e+00> : vector<8x128xf32>
      %14 = tpu.matmul %12, %13, %cst {dimension_numbers = #tpu.dot_dimension_numbers<[1], [0], [0], [1], [0, 0, 1, 1], [], []>} : vector<8x128xbf16>, vector<128x128xbf16>, vector<8x128xf32> -> vector<8x128xf32>
      %15 = arith.addf %11, %14 : vector<8x128xf32>
      %c0_9 = arith.constant 0 : index
      %c0_10 = arith.constant 0 : index
      %16 = vector.load %arg8[%c0_9, %c0_10] : memref<8x128xf32, #tpu.memory_space<vmem>>, vector<8x128xf32>
      tpu.vector_store %arg8[%c0_9, %c0_10], %15 {strides = array<i32>} : memref<8x128xf32, #tpu.memory_space<vmem>>, vector<8x128xf32>,
    } else {
    }
    %c0_i32_2 = arith.constant 0 : i32
    %8 = arith.cmpi eq, %arg2, %c0_i32_2 : i32
    %9 = arith.extui %8 : i1 to i32
    %c0_i32_3 = arith.constant 0 : i32
    %10 = arith.cmpi ne, %9, %c0_i32_3 : i32
    scf.if %10 {
      %c0 = arith.constant 0 : index
      %c0_4 = arith.constant 0 : index
      %11 = vector.load %arg8[%c0, %c0_4] : memref<8x128xf32, #tpu.memory_space<vmem>>, vector<8x128xf32>
      %c0_5 = arith.constant 0 : index
      %c0_6 = arith.constant 0 : index
      %12 = vector.load %arg6[%c0_5, %c0_6] : memref<1x128xf32, #tpu.memory_space<vmem>>, vector<1x128xf32>
      %13 = vector.broadcast %12 : vector<1x128xf32> to vector<8x128xf32>
      %14 = arith.addf %11, %13 : vector<8x128xf32>
      %c0_7 = arith.constant 0 : index
      %c0_8 = arith.constant 0 : index
      %15 = vector.load %arg7[%c0_7, %c0_8] : memref<8x128xf32, #tpu.memory_space<vmem>>, vector<8x128xf32>
      tpu.vector_store %arg7[%c0_7, %c0_8], %14 {strides = array<i32>} : memref<8x128xf32, #tpu.memory_space<vmem>>, vector<8x128xf32>,
    } else {
    }
    return
  }
  func.func @transform_0(%arg0: i32, %arg1: i32, %arg2: i32, %arg3: memref<1xi32, #tpu.memory_space<smem>>) -> (i32, i32) {
    %0 = arith.index_cast %arg1 : i32 to index
    %1 = memref.load %arg3[%0] : memref<1xi32, #tpu.memory_space<smem>>
    %c1_i32 = arith.constant 1 : i32
    %2 = arith.subi %1, %c1_i32 : i32
    %c0_i32 = arith.constant 0 : i32
    %3 = arith.maxsi %2, %c0_i32 : i32
    %4 = arith.minsi %arg2, %3 : i32
    %c0_i32_0 = arith.constant 0 : i32
    return %arg0, %4 : i32, i32
  }
  func.func @transform_1(%arg0: i32, %arg1: i32, %arg2: i32, %arg3: memref<1xi32, #tpu.memory_space<smem>>) -> (i32, i32) {
    %0 = arith.index_cast %arg1 : i32 to index
    %1 = memref.load %arg3[%0] : memref<1xi32, #tpu.memory_space<smem>>
    %c1_i32 = arith.constant 1 : i32
    %2 = arith.subi %1, %c1_i32 : i32
    %c0_i32 = arith.constant 0 : i32
    %3 = arith.maxsi %2, %c0_i32 : i32
    %4 = arith.minsi %arg2, %3 : i32
    %c0_i32_0 = arith.constant 0 : i32
    return %4, %arg1 : i32, i32
  }
  func.func @transform_2(%arg0: i32, %arg1: i32, %arg2: i32, %arg3: memref<1xi32, #tpu.memory_space<smem>>) -> (i32, i32) {
    %c0_i32 = arith.constant 0 : i32
    %c0_i32_0 = arith.constant 0 : i32
    return %c0_i32, %arg1 : i32, i32
  }
  func.func @transform_3(%arg0: i32, %arg1: i32, %arg2: i32, %arg3: memref<1xi32, #tpu.memory_space<smem>>) -> (i32, i32) {
    %c0_i32 = arith.constant 0 : i32
    return %arg0, %arg1 : i32, i32
  }
}

</mosaic_0001>

<bundles_post_ra>
// kernel: _masked_linear_call.1
= control target key start
LH: loop header
LB: loop body
LE: loop exit
PB: predicated region body
PF: predicated region fallthrough
CT: control target
= control target key end

     0   :  { %10 = vsyncpa [#allocation6], 0  ;;  %s436_s0 = inlined_call_operand.<no memory space> [shape: s32[1], index: 0, kind: input, shape index: {}]   ;;  %s437_s1 = inlined_call_operand.vmem [shape: bf16[8,128], index: 1, kind: input, shape index: {}]   ;;  %s438_s2 = inlined_call_operand.hbm [shape: bf16[128,128], index: 2, kind: input, shape index: {}]   ;;  %s439_s3 = inlined_call_operand.vmem [shape: f32[1,128], index: 3, kind: input, shape index: {}]   ;;  %s440_s4 = inlined_call_operand.hbm [shape: f32[8,128], index: 4, kind: output, shape index: {}]  }
   0x1   :  { %11 = vsyncpa [#allocation7], 0  ;;  %s244_s17 = sadd.s32 4294967295, %s436_s0  ;;  %s371_s18 = smov [#allocation5]  }
   0x2   :  { %p34_p0 = scmp.gt.s32.totalorder %s244_s17, 0  ;;  %s44_s19 = sshll.u32 %s371_s18, 4  ;;  %s45_s19 = int_to_ptr.vmem [resolvable:$true] %s44_s19 }
   0x3   :  { %s323_s27 = scalar_lea.hbm %s438_s2, 1024 }
   0x4   :  { %s442_s17 = smov (!%p34_p0, %s244_s17), 0 }
   0x5   :  { %s444_s17 = smov (%p34_p0, %s442_s17), 0 }
   0x6   :  { %s268_s20 = sshll.u32 %s444_s17, 10 }
   0x7   :  { %s43_s23 = scalar_lea.hbm %s438_s2, %s268_s20 }
   0x8   :  { %s321_s24 = scalar_lea.hbm %s43_s23, 1024  ;;  %p324_p2 = scmp.lt.u32.totalorder %s43_s23, %s438_s2 }
   0x9   :  { %p322_p1 = scmp.ne.s32.totalorder %s43_s23, %s321_s24  ;;  %p325_p3 = scmp.lt.u32.totalorder %s323_s27, %s321_s24 }
   0xa   :  { %p327_p5 = scmp.lt.u32.totalorder %s321_s24, %s43_s23 }
   0xb   :  { %p326_p4 = por %p325_p3, %p324_p2 }
   0xd   :  { %p328_p6 = por %p327_p5, %p326_p4 }
   0xf   :  { %p329_p7 = pnand %p328_p6, %p322_p1 }
  0x11   :  { %332 = shalt.err (!%p329_p7)
}
  0x12   :  { %s333_s30 = scalar_lea.vmem %s45_s19, 1024  ;;  %p338_p9 = scmp.lt.s32.totalorder %s45_s19, %s45_s19 }
  0x13   :  { %p334_p8 = scmp.ne.s32.totalorder %s45_s19, %s333_s30  ;;  %p339_p10 = scmp.lt.s32.totalorder %s333_s30, %s333_s30 }
  0x15   :  { %p340_p11 = por %p339_p10, %p338_p9 }
  0x17   :  { %p341_p12 = pnand %p340_p11, %p334_p8 }
  0x19   :  { %344 = shalt.err (!%p341_p12)
}
  0x1a   :  { %s372_s5 = smov 64   ;;  %s373_s6 = smov 4  }
  0x1b   :  { %50 = dma.hbm_to_vmem [thread:$0]  %s43_s23, 1024, %s45_s19, [#allocation6], %s372_s5, %s372_s5, %s373_s6  }
  0x1c   :  { %367 = dma.done.wait [#allocation6], 1024  }
  0x1d   :  { %368 = vsyncadd [#allocation6], 4294966272  ;;  %v374_v0 = vmov 0.0   ;;  %p255_p13 = scmp.le.s32.totalorder %s436_s0, 0 }
  0x1e   :  { %94 = vst [vmem:[#allocation2] sm:$0xff] %v374_v0  ;;  %v313_v1 = vld [vmem:[#allocation5] sm:$0xff] (!%p255_p13)   ;;  %v375_v2 = vmov (!%p255_p13), 0.0   ;;  %v314_v3 = vld [vmem:[#allocation5 + $0x8] sm:$0xff] (!%p255_p13)   ;;  %vm376_vm0 = vmmov (!%p255_p13), 0   ;;  %v315_v4 = vld [vmem:[#allocation5 + $0x10] sm:$0xff] (!%p255_p13)  }
  0x1f   :  { %99 = sbr.rel (%p255_p13) target bundleno = 278 (0x116), region = 25  ;;  %286 = vmatprep.subr.bf16.mxu0 (!%p255_p13), %v375_v2  ;;  %302 = vmatprep.mubr.msk.bf16.mxu0 (!%p255_p13), %vm376_vm0, %v375_v2  ;;  %v316_v5 = vld [vmem:[#allocation5 + $0x18] sm:$0xff] (!%p255_p13)   ;;  %v317_v6 = vld [vmem:[#allocation5 + $0x20] sm:$0xff] (!%p255_p13)   ;;  %v318_v7 = vld [vmem:[#allocation5 + $0x28] sm:$0xff] (!%p255_p13)  }
  0x20   :  { %287 = vmatpush3.bf16.msra.mxu0 (!%p255_p13), %v313_v1  ;;  %v319_v8 = vld [vmem:[#allocation5 + $0x30] sm:$0xff] (!%p255_p13)   ;;  %v320_v9 = vld [vmem:[#allocation5 + $0x38] sm:$0xff] (!%p255_p13)  }
  0x21   :  { %288 = vmatprep.subr.bf16.mxu0 (!%p255_p13), %v375_v2  ;;  %v101_v10 = vld [vmem:[%s437_s1] sm:$0xf] (!%p255_p13) }
  0x24   :  { %289 = vmatpush3.bf16.msra.mxu0 (!%p255_p13), %v314_v3 }
  0x25   :  { %290 = vmatprep.subr.bf16.mxu0 (!%p255_p13), %v375_v2  ;;  %v100_v11 = vld [vmem:[#allocation2] sm:$0xff] (!%p255_p13) }
  0x28   :  { %291 = vmatpush3.bf16.msra.mxu0 %v315_v4 }
  0x29   :  { %292 = vmatprep.subr.bf16.mxu0 %v375_v2 }
  0x2c   :  { %293 = vmatpush3.bf16.msra.mxu0 %v316_v5 }
  0x2d   :  { %294 = vmatprep.subr.bf16.mxu0 %v375_v2 }
  0x30   :  { %295 = vmatpush3.bf16.msra.mxu0 %v317_v6 }
  0x31   :  { %296 = vmatprep.subr.bf16.mxu0 %v375_v2 }
  0x34   :  { %297 = vmatpush3.bf16.msra.mxu0 %v318_v7 }
  0x35   :  { %298 = vmatprep.subr.bf16.mxu0 %v375_v2 }
  0x38   :  { %299 = vmatpush3.bf16.msra.mxu0 %v319_v8 }
  0x39   :  { %300 = vmatprep.subr.bf16.mxu0 %v375_v2 }
  0x3c   :  { %301 = vmatpush3.bf16.msra.mxu0 %v320_v9 }
  0x3f   :  { %303 = vmatmul.mubr.bf16.vlgmr.msra.gmra.mrb[0].mxu0 %v101_v10 }
 0x112   :  { %v200_v12 = vpop.f32.mrb[0].mxu0 }
 0x113   :  { %v206_v13 = vadd.f32 %v200_v12, %v100_v11  ;;  %v304_v14 = vpop.f32.mrb[1].mxu0 }
 0x114   :  { %v203_v15 = vpop.f32.mrb[2].mxu0 }
 0x115   :  { %207 = vst [vmem:[#allocation2] sm:$0xff] %v206_v13  ;;  %v305_v16 = vpop.f32.mrb[3].mxu0 }
 0x116 PF:  { %v264_v18 = vld [vmem:[%s439_s3] ss:$0 sm:$0xff]  ;;  %s377_s11 = smov [#allocation8]  }
 0x117   :  { %s227_s12 = sshll.u32 %s377_s11, 4  ;;  %s228_s12 = int_to_ptr.vmem [resolvable:$true] %s227_s12 }
 0x118   :  { %s345_s1 = scalar_lea.vmem %s228_s12, 128  ;;  %p350_p1 = scmp.lt.s32.totalorder %s228_s12, %s228_s12 }
 0x119   :  { %p346_p0 = scmp.ne.s32.totalorder %s228_s12, %s345_s1  ;;  %p351_p2 = scmp.lt.s32.totalorder %s345_s1, %s345_s1 }
 0x11b   :  { %p352_p3 = por %p351_p2, %p350_p1 }
 0x11c   :  { %v211_v17 = vld [vmem:[#allocation2] sm:$0xff] }
 0x11d   :  { %v219_v19 = vadd.f32 %v264_v18, %v211_v17  ;;  %p353_p4 = pnand %p352_p3, %p346_p0 }
 0x11f   :  { %220 = vst [vmem:[#allocation8] sm:$0xff] %v219_v19 }
 0x120   :  { %356 = shalt.err (!%p353_p4)
}
 0x121   :  { %s357_s15 = scalar_lea.hbm %s440_s4, 128 }
 0x122   :  { %p358_p5 = scmp.ne.s32.totalorder %s440_s4, %s357_s15  ;;  %p361_p6 = scmp.lt.u32.totalorder %s357_s15, %s440_s4 }
 0x124   :  { %p363_p7 = pnand %p361_p6, %p358_p5 }
 0x126   :  { %366 = shalt.err (!%p363_p7)
}
 0x127   :  { %230 = dma.vmem_to_hbm [thread:$0]  %s228_s12, 128, %s440_s4, [#allocation7]  }
 0x128   :  { %369 = dma.done.wait [#allocation7], 128  }
 0x129   :  { %370 = vsyncadd [#allocation7], 4294967168 }
 0x12a   :  { %234 = vsyncpa [#allocation6], 1 }
 0x12b   :  { %235 = vsyncpa [#allocation7], 1 }

</bundles_post_ra>
